<compile_context>
chip_gen: v7x
topology: tpu7x:2x2x1
jax: 0.10.0
libtpu: 0.0.40
codegen_flags: <defaults>
</compile_context>

<pallas_src>
import functools

import jax
import jax.numpy as jnp
from jax.experimental import pallas as pl
from jax.experimental.pallas import tpu as pltpu

HIDDEN = 64   # true hidden width of the PyTorch module
HID = 128     # lane-padded hidden width used inside the kernel


def _round_up(n, m):
    return (n + m - 1) // m * m


# ----------------------------------------------------------------------------
# Kernel
# ----------------------------------------------------------------------------
def knot_mlp_kernel(x_ref, w1_ref, w2_ref, wh_ref, b_ref, out_ref, *, value_col):
    """fc1 -> relu -> fc2 -> relu -> fused [policy | value] head (lane-dense)."""
    # x.float()
    x = x_ref[...].astype(jnp.float32)

    b1 = b_ref[0:1, :HID]   # fc1 bias (padded to 128 lanes)
    b2 = b_ref[1:2, :HID]   # fc2 bias
    bh = b_ref[2:3, :]      # fused head bias [1, OUT_W]

    h1 = jnp.dot(x, w1_ref[...], preferred_element_type=jnp.float32) + b1
    h1 = jnp.maximum(h1, 0.0)

    h2 = jnp.dot(h1, w2_ref[...], preferred_element_type=jnp.float32) + b2
    h2 = jnp.maximum(h2, 0.0)

    # Single fused head matmul: columns [0:A) = policy logits, column A = value.
    heads = jnp.dot(h2, wh_ref[...], preferred_element_type=jnp.float32) + bh

    # tanh only on the value column; policy columns pass through untouched.
    col = jax.lax.broadcasted_iota(jnp.int32, heads.shape, dimension=1)
    out_ref[...] = jnp.where(col == value_col, jnp.tanh(heads), heads)


# ----------------------------------------------------------------------------
# One-time parameter preparation (hoisted out of the per-call path)
# ----------------------------------------------------------------------------
def prepare_params(params):
    """Transpose PyTorch [out,in] weights to [in,out], zero-pad the hidden dim
    to 128 lanes, fuse the policy/value heads into one lane-dense matrix, and
    pack all biases into a single [3, OUT_W] buffer.  Call once, cache result.
    """
    f32 = jnp.float32
    in_size = params["fc1_w"].shape[1]
    action_size = params["fcp_w"].shape[0]
    out_w = max(128, _round_up(action_size + 1, 128))

    w1 = jnp.zeros((in_size, HID), f32).at[:, :HIDDEN].set(
        params["fc1_w"].T.astype(f32))
    w2 = jnp.zeros((HID, HID), f32).at[:HIDDEN, :HIDDEN].set(
        params["fc2_w"].T.astype(f32))

    wh = jnp.zeros((HID, out_w), f32)
    wh = wh.at[:HIDDEN, :action_size].set(params["fcp_w"].T.astype(f32))
    wh = wh.at[:HIDDEN, action_size].set(params["fcv_w"].astype(f32).reshape(HIDDEN))

    b = jnp.zeros((3, out_w), f32)
    b = b.at[0, :HIDDEN].set(params["fc1_b"].astype(f32))
    b = b.at[1, :HIDDEN].set(params["fc2_b"].astype(f32))
    b = b.at[2, :action_size].set(params["fcp_b"].astype(f32))
    b = b.at[2, action_size].set(params["fcv_b"].astype(f32)[0])

    return dict(w1=w1, w2=w2, wh=wh, b=b)


# ----------------------------------------------------------------------------
# Forward wrapper
# ----------------------------------------------------------------------------
def knot_nnet_forward(x, w1, w2, wh, b, *, action_size, block_rows=512):
    """Returns (policy [B, A] f32, value [B, 1] f32)."""
    B, in_size = x.shape
    out_w = wh.shape[1]

    # Batch tile: largest of (8-row-aligned B) up to block_rows, multiple of 8.
    bt = _round_up(min(block_rows, max(B, 8)), 8)
    b_pad = _round_up(B, bt)
    xp = x if b_pad == B else jnp.pad(x, ((0, b_pad - B), (0, 0)))

    flops = 2 * b_pad * (in_size * HID + HID * HID + HID * out_w)
    bytes_accessed = (
        b_pad * in_size * xp.dtype.itemsize
        + (w1.size + w2.size + wh.size + b.size) * 4
        + b_pad * out_w * 4
    )

    kernel = functools.partial(knot_mlp_kernel, value_col=action_size)

    out = pl.pallas_call(
        kernel,
        out_shape=jax.ShapeDtypeStruct((b_pad, out_w), jnp.float32),
        grid=(b_pad // bt,),
        in_specs=[
            pl.BlockSpec((bt, in_size), lambda i: (i, 0)),      # x: tiled on batch
            pl.BlockSpec((in_size, HID), lambda i: (0, 0)),     # w1: resident
            pl.BlockSpec((HID, HID), lambda i: (0, 0)),         # w2: resident
            pl.BlockSpec((HID, out_w), lambda i: (0, 0)),       # fused head: resident
            pl.BlockSpec((3, out_w), lambda i: (0, 0)),         # packed biases
        ],
        out_specs=pl.BlockSpec((bt, out_w), lambda i: (i, 0)),
        compiler_params=pltpu.CompilerParams(
            dimension_semantics=("parallel",),
        ),
        cost_estimate=pl.CostEstimate(
            flops=flops,
            transcendentals=b_pad * out_w,
            bytes_accessed=bytes_accessed,
        ),
    )(xp, w1, w2, wh, b)

    policy = out[:B, :action_size]
    value = out[:B, action_size:action_size + 1]   # tanh already applied in-kernel
    return policy, value


# ----------------------------------------------------------------------------
# Synthetic init + pure-JAX reference (mirrors the PyTorch forward exactly)
# ----------------------------------------------------------------------------
def init_params(key, input_size, action_size, hidden=HIDDEN):
    ks = jax.random.split(key, 8)

    def lin(kw, kb, out_f, in_f):
        bound = 1.0 / jnp.sqrt(jnp.float32(in_f))
        w = jax.random.uniform(kw, (out_f, in_f), jnp.float32, -bound, bound)
        bb = jax.random.uniform(kb, (out_f,), jnp.float32, -bound, bound)
        return w, bb

    fc1_w, fc1_b = lin(ks[0], ks[1], hidden, input_size)
    fc2_w, fc2_b = lin(ks[2], ks[3], hidden, hidden)
    fcp_w, fcp_b = lin(ks[4], ks[5], action_size, hidden)
    fcv_w, fcv_b = lin(ks[6], ks[7], 1, hidden)
    return dict(fc1_w=fc1_w, fc1_b=fc1_b, fc2_w=fc2_w, fc2_b=fc2_b,
                fcp_w=fcp_w, fcp_b=fcp_b, fcv_w=fcv_w, fcv_b=fcv_b)


def reference_forward(x, p):
    xf = x.astype(jnp.float32)
    h1 = jax.nn.relu(xf @ p["fc1_w"].T + p["fc1_b"])
    h2 = jax.nn.relu(h1 @ p["fc2_w"].T + p["fc2_b"])
    policy = h2 @ p["fcp_w"].T + p["fcp_b"]
    value = jnp.tanh(h2 @ p["fcv_w"].T + p["fcv_b"])
    return policy, value


if __name__ == "__main__":
    key = jax.random.PRNGKey(0)
    k_x, k_x2, k_p = jax.random.split(key, 3)

    # Small shapes implied by the module: a flat canonical game state and a
    # discrete action space.
    batch = 4
    input_size = 16   # len(game.get_canonical_form())
    action_size = 8   # game.get_action_size()

    x = jax.random.normal(k_x, (batch, input_size), jnp.float32)
    params = init_params(k_p, input_size, action_size)

    # One-time (cached) weight prep — hoisted out of the per-call path.
    prep = prepare_params(params)

    fwd = jax.jit(functools.partial(knot_nnet_forward, action_size=action_size))

    policy, value = fwd(x, prep["w1"], prep["w2"], prep["wh"], prep["b"])
    policy = jax.block_until_ready(policy)
    value = jax.block_until_ready(value)

    ref_policy, ref_value = reference_forward(x, params)
    assert policy.shape == (batch, action_size)
    assert value.shape == (batch, 1)
    assert jnp.allclose(policy, ref_policy, atol=1e-4, rtol=1e-4)
    assert jnp.allclose(value, ref_value, atol=1e-4, rtol=1e-4)

    # Larger batch: exercises the batch grid (multiple tiles + row padding).
    big_batch = 1200
    x_big = jax.random.normal(k_x2, (big_batch, input_size), jnp.float32)
    policy_b, value_b = fwd(x_big, prep["w1"], prep["w2"], prep["wh"], prep["b"])
    policy_b = jax.block_until_ready(policy_b)
    value_b = jax.block_until_ready(value_b)

    ref_policy_b, ref_value_b = reference_forward(x_big, params)
    assert policy_b.shape == (big_batch, action_size)
    assert value_b.shape == (big_batch, 1)
    assert jnp.allclose(policy_b, ref_policy_b, atol=1e-4, rtol=1e-4)
    assert jnp.allclose(value_b, ref_value_b, atol=1e-4, rtol=1e-4)

    print("KERNEL_OK")
</pallas_src>

<mosaic_0001>
module attributes {stable_mosaic.version = 11 : i64} {
  func.func @knot_mlp_kernel(%arg0: i32, %arg1: memref<8x16xf32, #tpu.memory_space<vmem>>, %arg2: memref<16x128xf32, #tpu.memory_space<vmem>>, %arg3: memref<128x128xf32, #tpu.memory_space<vmem>>, %arg4: memref<128x128xf32, #tpu.memory_space<vmem>>, %arg5: memref<3x128xf32, #tpu.memory_space<vmem>>, %arg6: memref<8x128xf32, #tpu.memory_space<vmem>>) attributes {dimension_semantics = [#tpu.dimension_semantics<parallel>], iteration_bounds = array<i64: 1>, scalar_prefetch = 0 : i64, scratch_operands = 0 : i64, tpu.core_type = #tpu.core_type<tc>, window_params = [{transform_indices = @transform_0, window_bounds = array<i64: 8, 16>}, {pipeline_mode = #tpu.pipeline_mode<synchronous>, transform_indices = @transform_1, window_bounds = array<i64: 16, 128>}, {pipeline_mode = #tpu.pipeline_mode<synchronous>, transform_indices = @transform_2, window_bounds = array<i64: 128, 128>}, {pipeline_mode = #tpu.pipeline_mode<synchronous>, transform_indices = @transform_3, window_bounds = array<i64: 128, 128>}, {pipeline_mode = #tpu.pipeline_mode<synchronous>, transform_indices = @transform_4, window_bounds = array<i64: 3, 128>}, {transform_indices = @transform_5, window_bounds = array<i64: 8, 128>}]} {
    %c0 = arith.constant 0 : index
    %c0_0 = arith.constant 0 : index
    %0 = vector.load %arg1[%c0, %c0_0] : memref<8x16xf32, #tpu.memory_space<vmem>>, vector<8x16xf32>
    %c0_1 = arith.constant 0 : index
    %c0_2 = arith.constant 0 : index
    %1 = vector.load %arg5[%c0_1, %c0_2] : memref<3x128xf32, #tpu.memory_space<vmem>>, vector<1x128xf32>
    %c1 = arith.constant 1 : index
    %c0_3 = arith.constant 0 : index
    %2 = vector.load %arg5[%c1, %c0_3] : memref<3x128xf32, #tpu.memory_space<vmem>>, vector<1x128xf32>
    %c2 = arith.constant 2 : index
    %c0_4 = arith.constant 0 : index
    %3 = vector.load %arg5[%c2, %c0_4] : memref<3x128xf32, #tpu.memory_space<vmem>>, vector<1x128xf32>
    %c0_5 = arith.constant 0 : index
    %c0_6 = arith.constant 0 : index
    %4 = vector.load %arg2[%c0_5, %c0_6] : memref<16x128xf32, #tpu.memory_space<vmem>>, vector<16x128xf32>
    %cst = arith.constant dense<0.000000e+00> : vector<8x128xf32>
    %5 = tpu.matmul %0, %4, %cst {dimension_numbers = #tpu.dot_dimension_numbers<[1], [0], [0], [1], [0, 0, 1, 1], [], []>} : vector<8x16xf32>, vector<16x128xf32>, vector<8x128xf32> -> vector<8x128xf32>
    %6 = vector.broadcast %1 : vector<1x128xf32> to vector<8x128xf32>
    %7 = arith.addf %5, %6 : vector<8x128xf32>
    %cst_7 = arith.constant 0.000000e+00 : f32
    %8 = vector.broadcast %cst_7 : f32 to vector<8x128xf32>
    %9 = arith.maximumf %7, %8 : vector<8x128xf32>
    %c0_8 = arith.constant 0 : index
    %c0_9 = arith.constant 0 : index
    %10 = vector.load %arg3[%c0_8, %c0_9] : memref<128x128xf32, #tpu.memory_space<vmem>>, vector<128x128xf32>
    %cst_10 = arith.constant dense<0.000000e+00> : vector<8x128xf32>
    %11 = tpu.matmul %9, %10, %cst_10 {dimension_numbers = #tpu.dot_dimension_numbers<[1], [0], [0], [1], [0, 0, 1, 1], [], []>} : vector<8x128xf32>, vector<128x128xf32>, vector<8x128xf32> -> vector<8x128xf32>
    %12 = vector.broadcast %2 : vector<1x128xf32> to vector<8x128xf32>
    %13 = arith.addf %11, %12 : vector<8x128xf32>
    %cst_11 = arith.constant 0.000000e+00 : f32
    %14 = vector.broadcast %cst_11 : f32 to vector<8x128xf32>
    %15 = arith.maximumf %13, %14 : vector<8x128xf32>
    %c0_12 = arith.constant 0 : index
    %c0_13 = arith.constant 0 : index
    %16 = vector.load %arg4[%c0_12, %c0_13] : memref<128x128xf32, #tpu.memory_space<vmem>>, vector<128x128xf32>
    %cst_14 = arith.constant dense<0.000000e+00> : vector<8x128xf32>
    %17 = tpu.matmul %15, %16, %cst_14 {dimension_numbers = #tpu.dot_dimension_numbers<[1], [0], [0], [1], [0, 0, 1, 1], [], []>} : vector<8x128xf32>, vector<128x128xf32>, vector<8x128xf32> -> vector<8x128xf32>
    %18 = vector.broadcast %3 : vector<1x128xf32> to vector<8x128xf32>
    %19 = arith.addf %17, %18 : vector<8x128xf32>
    %20 = tpu.iota {dimensions = array<i32: 1>} : vector<8x128xi32>
    %c8_i32 = arith.constant 8 : i32
    %21 = vector.broadcast %c8_i32 : i32 to vector<8x128xi32>
    %22 = arith.cmpi eq, %20, %21 : vector<8x128xi32>
    %23 = math.tanh %19 : vector<8x128xf32>
    %24 = arith.select %22, %23, %19 : vector<8x128xi1>, vector<8x128xf32>
    %c0_15 = arith.constant 0 : index
    %c0_16 = arith.constant 0 : index
    %25 = vector.load %arg6[%c0_15, %c0_16] : memref<8x128xf32, #tpu.memory_space<vmem>>, vector<8x128xf32>
    tpu.vector_store %arg6[%c0_15, %c0_16], %24 {strides = array<i32>} : memref<8x128xf32, #tpu.memory_space<vmem>>, vector<8x128xf32>,
    return
  }
  func.func @transform_0(%arg0: i32) -> (i32, i32) {
    %c0_i32 = arith.constant 0 : i32
    %c0_i32_0 = arith.constant 0 : i32
    return %arg0, %c0_i32 : i32, i32
  }
  func.func @transform_1(%arg0: i32) -> (i32, i32) {
    %c0_i32 = arith.constant 0 : i32
    %c0_i32_0 = arith.constant 0 : i32
    %c0_i32_1 = arith.constant 0 : i32
    return %c0_i32, %c0_i32_0 : i32, i32
  }
  func.func @transform_2(%arg0: i32) -> (i32, i32) {
    %c0_i32 = arith.constant 0 : i32
    %c0_i32_0 = arith.constant 0 : i32
    %c0_i32_1 = arith.constant 0 : i32
    return %c0_i32, %c0_i32_0 : i32, i32
  }
  func.func @transform_3(%arg0: i32) -> (i32, i32) {
    %c0_i32 = arith.constant 0 : i32
    %c0_i32_0 = arith.constant 0 : i32
    %c0_i32_1 = arith.constant 0 : i32
    return %c0_i32, %c0_i32_0 : i32, i32
  }
  func.func @transform_4(%arg0: i32) -> (i32, i32) {
    %c0_i32 = arith.constant 0 : i32
    %c0_i32_0 = arith.constant 0 : i32
    %c0_i32_1 = arith.constant 0 : i32
    return %c0_i32, %c0_i32_0 : i32, i32
  }
  func.func @transform_5(%arg0: i32) -> (i32, i32) {
    %c0_i32 = arith.constant 0 : i32
    %c0_i32_0 = arith.constant 0 : i32
    return %arg0, %c0_i32 : i32, i32
  }
}

</mosaic_0001>

<bundles_post_ra>
// kernel: knot_nnet_forward.1
= control target key start
LH: loop header
LB: loop body
LE: loop exit
PB: predicated region body
PF: predicated region fallthrough
CT: control target
= control target key end

     0   :  { %10 = vsyncpa [#allocation3], 0  ;;  %s654_s0 = inlined_call_operand.vmem [shape: f32[8,16], index: 0, kind: input, shape index: {}]   ;;  %s655_s1 = inlined_call_operand.vmem [shape: f32[16,128], index: 1, kind: input, shape index: {}]   ;;  %s656_s2 = inlined_call_operand.hbm [shape: f32[128,128], index: 2, kind: input, shape index: {}]   ;;  %s657_s3 = inlined_call_operand.hbm [shape: f32[128,128], index: 3, kind: input, shape index: {}]   ;;  %s658_s4 = inlined_call_operand.vmem [shape: f32[3,128], index: 4, kind: input, shape index: {}]   ;;  %s659_s5 = inlined_call_operand.vmem [shape: f32[8,128], index: 5, kind: output, shape index: {}]  }
   0x1   :  { %11 = vsyncpa [#allocation5], 0  ;;  %s552_s18 = smov [#allocation2]   ;;  %s504_s22 = scalar_lea.hbm %s656_s2, 2048 }
   0x2   :  { %s21_s19 = sshll.u32 %s552_s18, 4  ;;  %p505_p0 = scmp.ne.s32.totalorder %s656_s2, %s504_s22  ;;  %s22_s19 = int_to_ptr.vmem [resolvable:$true] %s21_s19 }
   0x3   :  { %p508_p1 = scmp.lt.u32.totalorder %s504_s22, %s656_s2 }
   0x5   :  { %p510_p2 = pnand %p508_p1, %p505_p0 }
   0x7   :  { %513 = shalt.err (!%p510_p2)
}
   0x8   :  { %s514_s27 = scalar_lea.vmem %s22_s19, 2048  ;;  %p519_p4 = scmp.lt.s32.totalorder %s22_s19, %s22_s19 }
   0x9   :  { %p515_p3 = scmp.ne.s32.totalorder %s22_s19, %s514_s27  ;;  %p520_p5 = scmp.lt.s32.totalorder %s514_s27, %s514_s27 }
   0xb   :  { %p521_p6 = por %p520_p5, %p519_p4 }
   0xd   :  { %p522_p7 = pnand %p521_p6, %p515_p3 }
   0xf   :  { %525 = shalt.err (!%p522_p7)
}
  0x10   :  { %s553_s28 = smov 128   ;;  %s554_s29 = smov 8  }
  0x11   :  { %27 = dma.hbm_to_vmem [thread:$0]  %s656_s2, 2048, %s22_s19, [#allocation3], %s553_s28, %s553_s28, %s554_s29  }
  0x12   :  { %s555_s7 = smov [#allocation4]   ;;  %s526_s11 = scalar_lea.hbm %s657_s3, 2048 }
  0x13   :  { %s33_s8 = sshll.u32 %s555_s7, 4  ;;  %p527_p8 = scmp.ne.s32.totalorder %s657_s3, %s526_s11  ;;  %s34_s8 = int_to_ptr.vmem [resolvable:$true] %s33_s8 }
  0x14   :  { %p530_p9 = scmp.lt.u32.totalorder %s526_s11, %s657_s3 }
  0x16   :  { %p532_p10 = pnand %p530_p9, %p527_p8 }
  0x18   :  { %535 = shalt.err (!%p532_p10)
}
  0x19   :  { %s536_s16 = scalar_lea.vmem %s34_s8, 2048  ;;  %p541_p12 = scmp.lt.s32.totalorder %s34_s8, %s34_s8 }
  0x1a   :  { %p537_p11 = scmp.ne.s32.totalorder %s34_s8, %s536_s16  ;;  %p542_p13 = scmp.lt.s32.totalorder %s536_s16, %s536_s16 }
  0x1c   :  { %p543_p0 = por %p542_p13, %p541_p12 }
  0x1e   :  { %p544_p1 = pnand %p543_p0, %p537_p11 }
  0x20   :  { %547 = shalt.err (!%p544_p1)
}
  0x21   :  { %39 = dma.hbm_to_vmem [thread:$0]  %s657_s3, 2048, %s34_s8, [#allocation5], %s553_s28, %s553_s28, %s554_s29  }
  0x22   :  { %548 = dma.done.wait [#allocation3], 2048  }
  0x23   :  { %549 = vsyncadd [#allocation3], 4294965248 }
  0x24   :  { %550 = dma.done.wait [#allocation5], 2048  }
  0x25   :  { %551 = vsyncadd [#allocation5], 4294965248  ;;  %v556_v0 = vmov 0.0|0.0   ;;  %vm557_vm0 = vmmov 0   ;;  %v558_v1 = vmov 0.0   ;;  %v52_v2 = vld [vmem:[%s655_s1] sm:$0xff] }
  0x26   :  { %444 = vmatprep.subr.bf16.mxu0 %v556_v0  ;;  %371 = vmatprep.mubr.msk.f32.mxu0 %vm557_vm0, %v558_v1  ;;  %v53_v3 = vld [vmem:[%s655_s1 + $0x8] sm:$0xff]  ;;  %v133_v5 = vld [vmem:[#allocation2] sm:$0xff]  ;;  %v135_v7 = vld [vmem:[#allocation2 + $0x10] sm:$0xff]  ;;  %vm58_vm1 = vcmask 130048  }
  0x27   :  { %447 = vmatprep.subr.bf16.mxu1 %v556_v0  ;;  %406 = vmatprep.mubr.msk.f32.mxu1 %vm557_vm0, %v558_v1  ;;  %v445_v4 = vpack.c.bf16 %v53_v3, %v52_v2  ;;  %v134_v6 = vld [vmem:[#allocation2 + $0x8] sm:$0xff]  ;;  %v136_v9 = vld [vmem:[#allocation2 + $0x18] sm:$0xff]  ;;  %v48_v10 = vld [vmem:[%s654_s0] sm:$0xff] }
  0x28   :  { %v448_v8 = vpack.c.bf16 %v134_v6, %v133_v5  ;;  %v451_v11 = vpack.c.bf16 %v136_v9, %v135_v7  ;;  %v137_v12 = vld [vmem:[#allocation2 + $0x20] sm:$0xff]  ;;  %v138_v13 = vld [vmem:[#allocation2 + $0x28] sm:$0xff]  ;;  %v139_v15 = vld [vmem:[#allocation2 + $0x30] sm:$0xff] }
  0x29   :  { %446 = vmatpush3.bf16.msra.mxu0 %v445_v4  ;;  %v454_v14 = vpack.c.bf16 %v138_v13, %v137_v12  ;;  %v140_v16 = vld [vmem:[#allocation2 + $0x38] sm:$0xff]  ;;  %v141_v18 = vld [vmem:[#allocation2 + $0x40] sm:$0xff]  ;;  %v142_v19 = vld [vmem:[#allocation2 + $0x48] sm:$0xff]  ;;  %v314_v4 = vlaneseq }
  0x2a   :  { %449 = vmatpush3.bf16.msra.mxu1 %v448_v8  ;;  %471 = vmatprep.subr.bf16.mxu0 %v556_v0  ;;  %v457_v17 = vpack.c.bf16 %v140_v16, %v139_v15  ;;  %v460_v20 = vpack.c.bf16 %v142_v19, %v141_v18  ;;  %v143_v21 = vld [vmem:[#allocation2 + $0x50] sm:$0xff]  ;;  %v144_v22 = vld [vmem:[#allocation2 + $0x58] sm:$0xff]  ;;  %v145_v24 = vld [vmem:[#allocation2 + $0x60] sm:$0xff] }
  0x2b   :  { %450 = vmatprep.subr.bf16.mxu1 %v556_v0  ;;  %v463_v23 = vpack.c.bf16 %v144_v22, %v143_v21  ;;  %v146_v25 = vld [vmem:[#allocation2 + $0x68] sm:$0xff]  ;;  %v147_v27 = vld [vmem:[#allocation2 + $0x70] sm:$0xff]  ;;  %v148_v28 = vld [vmem:[#allocation2 + $0x78] sm:$0xff]  ;;  %v315_v5 = vand.u32 127, %v314_v4 }
  0x2c   :  { %372 = vmatmul.mubr.msk.f32.vlgmr.msra.gmra.mrb[0].mxu0 %vm58_vm1, %v48_v10  ;;  %v466_v26 = vpack.c.bf16 %v146_v25, %v145_v24  ;;  %v469_v29 = vpack.c.bf16 %v148_v28, %v147_v27  ;;  %v224_v30 = vld [vmem:[#allocation4] sm:$0xff]  ;;  %v225_v31 = vld [vmem:[#allocation4 + $0x8] sm:$0xff]  ;;  %v226_v32 = vld [vmem:[#allocation4 + $0x10] sm:$0xff] }
  0x2d   :  { %441 = vmatprep.mubr.msk.f32.mxu0 %vm557_vm0, %v558_v1  ;;  %v472_v33 = vpack.c.bf16 %v225_v31, %v224_v30  ;;  %v227_v34 = vld [vmem:[#allocation4 + $0x18] sm:$0xff]  ;;  %v228_v36 = vld [vmem:[#allocation4 + $0x20] sm:$0xff]  ;;  %v229_v37 = vld [vmem:[#allocation4 + $0x28] sm:$0xff]  ;;  %vm316_vm2 = vcmp.eq.s32.totalorder %v315_v5, 8 }
  0x2e   :  { %452 = vmatpush3.bf16.msra.mxu1 %v451_v11  ;;  %v475_v35 = vpack.c.bf16 %v227_v34, %v226_v32  ;;  %v478_v38 = vpack.c.bf16 %v229_v37, %v228_v36  ;;  %v230_v39 = vld [vmem:[#allocation4 + $0x30] sm:$0xff]  ;;  %v231_v40 = vld [vmem:[#allocation4 + $0x38] sm:$0xff]  ;;  %v232_v42 = vld [vmem:[#allocation4 + $0x40] sm:$0xff] }
  0x2f   :  { %453 = vmatprep.subr.bf16.mxu1 %v556_v0  ;;  %473 = vmatpush3.bf16.msra.mxu0 %v472_v33  ;;  %v481_v41 = vpack.c.bf16 %v231_v40, %v230_v39  ;;  %v233_v43 = vld [vmem:[#allocation4 + $0x48] sm:$0xff]  ;;  %v234_v45 = vld [vmem:[#allocation4 + $0x50] sm:$0xff]  ;;  %v235_v46 = vld [vmem:[#allocation4 + $0x58] sm:$0xff] }
  0x30   :  { %474 = vmatprep.subr.bf16.mxu0 %v556_v0  ;;  %v484_v44 = vpack.c.bf16 %v233_v43, %v232_v42  ;;  %v487_v47 = vpack.c.bf16 %v235_v46, %v234_v45  ;;  %v236_v48 = vld [vmem:[#allocation4 + $0x60] sm:$0xff]  ;;  %v237_v49 = vld [vmem:[#allocation4 + $0x68] sm:$0xff]  ;;  %v238_v56 = vld [vmem:[#allocation4 + $0x70] sm:$0xff] }
  0x31   :  { %v490_v50 = vpack.c.bf16 %v237_v49, %v236_v48  ;;  %v326_v51 = vld [vmem:[%s658_s4] ss:$0 sm:$0xff]  ;;  %v239_v57 = vld [vmem:[#allocation4 + $0x78] sm:$0xff]  ;;  %v328_v59 = vld [vmem:[%s658_s4 + $0x1] ss:$0 sm:$0xff] }
  0x32   :  { %455 = vmatpush3.bf16.msra.mxu1 %v454_v14  ;;  %v493_v58 = vpack.c.bf16 %v239_v57, %v238_v56 }
  0x33   :  { %456 = vmatprep.subr.bf16.mxu1 %v556_v0  ;;  %476 = vmatpush3.bf16.msra.mxu0 %v475_v35 }
  0x34   :  { %477 = vmatprep.subr.bf16.mxu0 %v556_v0 }
  0x36   :  { %458 = vmatpush3.bf16.msra.mxu1 %v457_v17 }
  0x37   :  { %459 = vmatprep.subr.bf16.mxu1 %v556_v0  ;;  %479 = vmatpush3.bf16.msra.mxu0 %v478_v38 }
  0x38   :  { %480 = vmatprep.subr.bf16.mxu0 %v556_v0 }
  0x3a   :  { %461 = vmatpush3.bf16.msra.mxu1 %v460_v20 }
  0x3b   :  { %462 = vmatprep.subr.bf16.mxu1 %v556_v0  ;;  %482 = vmatpush3.bf16.msra.mxu0 %v481_v41 }
  0x3c   :  { %483 = vmatprep.subr.bf16.mxu0 %v556_v0 }
  0x3e   :  { %464 = vmatpush3.bf16.msra.mxu1 %v463_v23 }
  0x3f   :  { %465 = vmatprep.subr.bf16.mxu1 %v556_v0  ;;  %485 = vmatpush3.bf16.msra.mxu0 %v484_v44 }
  0x40   :  { %486 = vmatprep.subr.bf16.mxu0 %v556_v0 }
  0x42   :  { %467 = vmatpush3.bf16.msra.mxu1 %v466_v26 }
  0x43   :  { %468 = vmatprep.subr.bf16.mxu1 %v556_v0  ;;  %488 = vmatpush3.bf16.msra.mxu0 %v487_v47 }
  0x44   :  { %489 = vmatprep.subr.bf16.mxu0 %v556_v0 }
  0x46   :  { %470 = vmatpush3.bf16.msra.mxu1 %v469_v29 }
  0x47   :  { %491 = vmatpush3.bf16.msra.mxu0 %v490_v50 }
  0x48   :  { %492 = vmatprep.subr.bf16.mxu0 %v556_v0  ;;  %v329_v0 = vld [vmem:[%s658_s4 + $0x2] ss:$0 sm:$0xff] }
  0x4b   :  { %494 = vmatpush3.bf16.msra.mxu0 %v493_v58 }
  0xff   :  { %v128_v52 = vpop.f32.mrb[0].mxu0 }
 0x100   :  { %v129_v53 = vadd.f32 %v326_v51, %v128_v52  ;;  %v373_v54 = vpop.f32.mrb[1].mxu0 }
 0x102   :  { %v132_v55 = vmax.f32 %v129_v53, 0.0 }
 0x104   :  { %407 = vmatmul.mubr.f32.vlgmr.msra.gmra.mrb[0].mxu1 %v132_v55 }
 0x1d7   :  { %v219_v60 = vpop.f32.mrb[0].mxu1 }
 0x1d8   :  { %v220_v61 = vadd.f32 %v328_v59, %v219_v60  ;;  %v408_v62 = vpop.f32.mrb[1].mxu1 }
 0x1da   :  { %v223_v63 = vmax.f32 %v220_v61, 0.0 }
 0x1dc   :  { %442 = vmatmul.mubr.f32.vlgmr.msra.gmra.mrb[2].mxu0 %v223_v63 }
 0x2af   :  { %v310_v1 = vpop.f32.mrb[2].mxu0 }
 0x2b0   :  { %v311_v2 = vadd.f32 %v329_v0, %v310_v1  ;;  %v443_v3 = vpop.f32.mrb[3].mxu0 }
 0x2b2   :  { %502 = vtanh.f32 %v311_v2 }
 0x2bc   :  { %v503_v6 = vpop.eup %502 }
 0x2bd   :  { %v318_v7 = vsel %vm316_vm2, %v503_v6, %v311_v2 }
 0x2be   :  { %319 = vst [vmem:[%s659_s5] sm:$0xff] %v318_v7 }
 0x2bf   :  { %324 = vsyncpa [#allocation3], 1 }
 0x2c0   :  { %325 = vsyncpa [#allocation5], 1 }

</bundles_post_ra>
